<compile_context>
chip_gen: v7x
topology: tpu7x:2x2x1
jax: 0.10.0
libtpu: 0.0.40
codegen_flags: <defaults>
</compile_context>

<pallas_src>
import math

import jax
import jax.numpy as jnp
from jax import lax
from jax.experimental import pallas as pl
from jax.experimental.pallas import tpu as pltpu


# Contract last dims: x (m,k) . w (n,k)  ==  x @ w.T, no explicit transpose.
_DN = (((1,), (1,)), ((), ()))


# ----------------------------------------------------------------------------
# Kernels
# ----------------------------------------------------------------------------
def _noisy_tiled_kernel(x_ref, xn_ref, wmu_ref, wsig_ref, eout_ref, b_ref,
                        o_ref, acc_mu_ref, acc_sig_ref):
    """3-D grid (M, N, K): out = x@w_mu.T + eps_out*((x*eps_in)@w_sig.T) + b."""
    k = pl.program_id(2)

    @pl.when(k == 0)
    def _():
        acc_mu_ref[...] = jnp.zeros_like(acc_mu_ref)
        acc_sig_ref[...] = jnp.zeros_like(acc_sig_ref)

    acc_mu_ref[...] += lax.dot_general(x_ref[...], wmu_ref[...], _DN,
                                       preferred_element_type=jnp.float32)
    acc_sig_ref[...] += lax.dot_general(xn_ref[...], wsig_ref[...], _DN,
                                        preferred_element_type=jnp.float32)

    @pl.when(k == pl.num_programs(2) - 1)
    def _():
        o_ref[...] = (acc_mu_ref[...] + eout_ref[...] * acc_sig_ref[...]
                      + b_ref[...]).astype(o_ref.dtype)


def _noisy_direct_kernel(x_ref, xn_ref, wmu_ref, wsig_ref, eout_ref, b_ref,
                         o_ref):
    """2-D grid (M, N), whole K in one block: no accumulator round trip."""
    mu = lax.dot_general(x_ref[...], wmu_ref[...], _DN,
                         preferred_element_type=jnp.float32)
    sg = lax.dot_general(xn_ref[...], wsig_ref[...], _DN,
                         preferred_element_type=jnp.float32)
    o_ref[...] = (mu + eout_ref[...] * sg + b_ref[...]).astype(o_ref.dtype)


def _plain_tiled_kernel(x_ref, wmu_ref, b_ref, o_ref, acc_ref):
    """Eval mode, 3-D grid: out = x @ w_mu.T + b_mu."""
    k = pl.program_id(2)

    @pl.when(k == 0)
    def _():
        acc_ref[...] = jnp.zeros_like(acc_ref)

    acc_ref[...] += lax.dot_general(x_ref[...], wmu_ref[...], _DN,
                                    preferred_element_type=jnp.float32)

    @pl.when(k == pl.num_programs(2) - 1)
    def _():
        o_ref[...] = (acc_ref[...] + b_ref[...]).astype(o_ref.dtype)


def _plain_direct_kernel(x_ref, wmu_ref, b_ref, o_ref):
    """Eval mode, 2-D grid, whole K per block."""
    o_ref[...] = (lax.dot_general(x_ref[...], wmu_ref[...], _DN,
                                  preferred_element_type=jnp.float32)
                  + b_ref[...]).astype(o_ref.dtype)


# ----------------------------------------------------------------------------
# Wrapper
# ----------------------------------------------------------------------------
def _round_up(v, m):
    return ((v + m - 1) // m) * m


def _pad2(a, rows, cols):
    pr, pc = rows - a.shape[0], cols - a.shape[1]
    if pr == 0 and pc == 0:
        return a                       # aligned: no per-call HBM copy
    return jnp.pad(a, ((0, pr), (0, pc)))


def noisy_linear(x, weight_mu, weight_sigma, bias_mu, bias_sigma,
                 eps_in, eps_out, *, training=True,
                 tm=128, tn=256, tk=1024):
    """Pallas TPU NoisyLinear.forward.

    eps_in (in_features,) / eps_out (out_features,) are the factorized noise
    vectors from reset_noise(); weight_epsilon == outer(eps_out, eps_in) and
    bias_epsilon == eps_out, so training mode computes exactly
        x @ (w_mu + w_sig * eps).T + (b_mu + b_sig * eps_out)
    restructured as two MXU matmuls.  Pass bf16 x / weights for the
    bf16-native MXU path (accumulation stays f32).
    """
    out_dtype = x.dtype
    B, K = x.shape
    N = weight_mu.shape[0]
    p_dtype = weight_mu.dtype
    if x.dtype != p_dtype:
        x = x.astype(p_dtype)

    # Lane-dense tiles (128-multiple N/K, 8-multiple M), clipped to the layer.
    tm = min(tm, _round_up(B, 8))
    tn = min(tn, _round_up(N, 128))
    tk = min(tk, _round_up(K, 128))
    Bp, Np, Kp = _round_up(B, tm), _round_up(N, tn), _round_up(K, tk)

    # v7x megacore: ensure >= 2 parallel (M, N) blocks when possible so the
    # "parallel" axes can actually be sharded across both TensorCores.
    if (Bp // tm) * (Np // tn) == 1 and tn >= 256:
        tn //= 2
        Np = _round_up(N, tn)

    gm, gn, kt = Bp // tm, Np // tn, Kp // tk

    if kt == 1:
        # Fast path: whole K per block -> no K grid axis, no accumulators.
        grid = (gm, gn)
        dims = ("parallel", "parallel")
        x_spec = pl.BlockSpec((tm, tk), lambda i, j: (i, 0))
        w_spec = pl.BlockSpec((tn, tk), lambda i, j: (j, 0))
        row_spec = pl.BlockSpec((1, tn), lambda i, j: (0, j))
        out_spec = pl.BlockSpec((tm, tn), lambda i, j: (i, j))
    else:
        grid = (gm, gn, kt)
        dims = ("parallel", "parallel", "arbitrary")
        x_spec = pl.BlockSpec((tm, tk), lambda i, j, k: (i, k))
        w_spec = pl.BlockSpec((tn, tk), lambda i, j, k: (j, k))
        row_spec = pl.BlockSpec((1, tn), lambda i, j, k: (0, j))
        out_spec = pl.BlockSpec((tm, tn), lambda i, j, k: (i, j))

    # VMEM budget: double-buffered tiles + f32 accumulators, with headroom.
    esz = jnp.dtype(p_dtype).itemsize
    est = (2 * (2 * tm * tk * esz + 2 * tn * tk * esz + 2 * tn * 4
                + tm * tn * jnp.dtype(out_dtype).itemsize)
           + 2 * tm * tn * 4)
    vmem_limit = int(min(64 * 1024 * 1024, max(32 * 1024 * 1024, 2 * est)))
    cparams = pltpu.CompilerParams(dimension_semantics=dims,
                                   vmem_limit_bytes=vmem_limit)

    xp = _pad2(x, Bp, Kp)
    wmu = _pad2(weight_mu, Np, Kp)
    out_shape = jax.ShapeDtypeStruct((Bp, Np), out_dtype)

    if training:
        # Pre-scale x by eps_in (B*K elementwise) and fold the full bias once.
        xn = _pad2(x * eps_in.astype(p_dtype)[None, :], Bp, Kp)
        wsig = _pad2(weight_sigma, Np, Kp)
        eout = _pad2(eps_out.reshape(1, N).astype(jnp.float32), 1, Np)
        bias = _pad2((bias_mu + bias_sigma * eps_out)
                     .reshape(1, N).astype(jnp.float32), 1, Np)
        kernel = _noisy_direct_kernel if kt == 1 else _noisy_tiled_kernel
        in_specs = [x_spec, x_spec, w_spec, w_spec, row_spec, row_spec]
        args = (xp, xn, wmu, wsig, eout, bias)
        scratch = [] if kt == 1 else [pltpu.VMEM((tm, tn), jnp.float32)] * 2
    else:
        # Eval mode: no sigma / epsilon HBM traffic at all.
        bias = _pad2(bias_mu.reshape(1, N).astype(jnp.float32), 1, Np)
        kernel = _plain_direct_kernel if kt == 1 else _plain_tiled_kernel
        in_specs = [x_spec, w_spec, row_spec]
        args = (xp, wmu, bias)
        scratch = [] if kt == 1 else [pltpu.VMEM((tm, tn), jnp.float32)]

    out = pl.pallas_call(
        kernel,
        out_shape=out_shape,
        grid_spec=pltpu.PrefetchScalarGridSpec(
            num_scalar_prefetch=0,
            grid=grid,
            in_specs=in_specs,
            out_specs=out_spec,
            scratch_shapes=scratch),
        compiler_params=cparams,
    )(*args)

    return out[:B, :N]


# ----------------------------------------------------------------------------
# Parameter / noise init mirroring NoisyLinear.__init__ + reset_noise()
# ----------------------------------------------------------------------------
def _scale_noise(key, size):
    # PyTorch: x.sign() * x.abs().sqrt() with x ~ N(0, 1)
    x = jax.random.normal(key, (size,), dtype=jnp.float32)
    return jnp.sign(x) * jnp.sqrt(jnp.abs(x))


def init_noisy_linear(key, in_features, out_features, sigma_init=0.017):
    k_wmu, k_bmu, k_ein, k_eout = jax.random.split(key, 4)
    bound = 1.0 / math.sqrt(in_features)

    weight_mu = jax.random.uniform(
        k_wmu, (out_features, in_features), jnp.float32, -bound, bound)
    weight_sigma = jnp.full((out_features, in_features),
                            sigma_init / math.sqrt(in_features), jnp.float32)
    bias_mu = jax.random.uniform(
        k_bmu, (out_features,), jnp.float32, -bound, bound)
    bias_sigma = jnp.full((out_features,),
                          sigma_init / math.sqrt(out_features), jnp.float32)

    # Factorized Gaussian noise (reset_noise): weight_epsilon = eps_out ⊗ eps_in.
    eps_in = _scale_noise(k_ein, in_features)
    eps_out = _scale_noise(k_eout, out_features)

    return dict(weight_mu=weight_mu, weight_sigma=weight_sigma,
                bias_mu=bias_mu, bias_sigma=bias_sigma,
                eps_in=eps_in, eps_out=eps_out)


if __name__ == "__main__":
    key = jax.random.PRNGKey(0)
    k_p1, k_x1, k_p2, k_x2 = jax.random.split(key, 4)

    # --- Small Rainbow-sized layer: exercises the single-K fast path. ---
    batch, in_features, out_features = 4, 32, 64
    p = init_noisy_linear(k_p1, in_features, out_features)
    x = jax.random.normal(k_x1, (batch, in_features), dtype=jnp.float32)

    out = jax.block_until_ready(
        noisy_linear(x, p["weight_mu"], p["weight_sigma"],
                     p["bias_mu"], p["bias_sigma"],
                     p["eps_in"], p["eps_out"], training=True))

    w_eps = jnp.outer(p["eps_out"], p["eps_in"])
    w_ref = p["weight_mu"] + p["weight_sigma"] * w_eps
    b_ref = p["bias_mu"] + p["bias_sigma"] * p["eps_out"]
    ref = x @ w_ref.T + b_ref
    assert out.shape == (batch, out_features)
    assert jnp.allclose(out, ref, atol=1e-4, rtol=1e-4)

    # Eval mode (plain linear kernel, no sigma / epsilon traffic).
    out_eval = jax.block_until_ready(
        noisy_linear(x, p["weight_mu"], p["weight_sigma"],
                     p["bias_mu"], p["bias_sigma"],
                     p["eps_in"], p["eps_out"], training=False))
    ref_eval = x @ p["weight_mu"].T + p["bias_mu"]
    assert jnp.allclose(out_eval, ref_eval, atol=1e-4, rtol=1e-4)

    # --- Larger layer with a small K tile to exercise the tiled 3-D path. ---
    b2, in2, out2 = 8, 256, 128
    p2 = init_noisy_linear(k_p2, in2, out2)
    x2 = jax.random.normal(k_x2, (b2, in2), dtype=jnp.float32)
    out2_k = jax.block_until_ready(
        noisy_linear(x2, p2["weight_mu"], p2["weight_sigma"],
                     p2["bias_mu"], p2["bias_sigma"],
                     p2["eps_in"], p2["eps_out"], training=True, tk=128))
    w_ref2 = p2["weight_mu"] + p2["weight_sigma"] * jnp.outer(p2["eps_out"],
                                                              p2["eps_in"])
    b_ref2 = p2["bias_mu"] + p2["bias_sigma"] * p2["eps_out"]
    ref2 = x2 @ w_ref2.T + b_ref2
    assert jnp.allclose(out2_k, ref2, atol=1e-4, rtol=1e-4)

    # --- bf16 operand path (MXU-native); numerics differ slightly. ---
    out_bf16 = jax.block_until_ready(
        noisy_linear(x.astype(jnp.bfloat16),
                     p["weight_mu"].astype(jnp.bfloat16),
                     p["weight_sigma"].astype(jnp.bfloat16),
                     p["bias_mu"], p["bias_sigma"],
                     p["eps_in"], p["eps_out"], training=True))
    assert jnp.allclose(out_bf16.astype(jnp.float32), ref, atol=6e-2, rtol=6e-2)

    print("KERNEL_OK")
</pallas_src>

<mosaic_0001>
module attributes {stable_mosaic.version = 11 : i64} {
  func.func @_noisy_direct_kernel(%arg0: i32, %arg1: i32, %arg2: memref<8x128xf32, #tpu.memory_space<vmem>>, %arg3: memref<8x128xf32, #tpu.memory_space<vmem>>, %arg4: memref<128x128xf32, #tpu.memory_space<vmem>>, %arg5: memref<128x128xf32, #tpu.memory_space<vmem>>, %arg6: memref<1x128xf32, #tpu.memory_space<vmem>>, %arg7: memref<1x128xf32, #tpu.memory_space<vmem>>, %arg8: memref<8x128xf32, #tpu.memory_space<vmem>>) attributes {dimension_semantics = [#tpu.dimension_semantics<parallel>, #tpu.dimension_semantics<parallel>], iteration_bounds = array<i64: 1, 1>, scalar_prefetch = 0 : i64, scratch_operands = 0 : i64, tpu.core_type = #tpu.core_type<tc>, window_params = [{transform_indices = @transform_0, window_bounds = array<i64: 8, 128>}, {transform_indices = @transform_1, window_bounds = array<i64: 8, 128>}, {transform_indices = @transform_2, window_bounds = array<i64: 128, 128>}, {transform_indices = @transform_3, window_bounds = array<i64: 128, 128>}, {transform_indices = @transform_4, window_bounds = array<i64: 1, 128>}, {transform_indices = @transform_5, window_bounds = array<i64: 1, 128>}, {transform_indices = @transform_6, window_bounds = array<i64: 8, 128>}]} {
    %c0 = arith.constant 0 : index
    %c0_0 = arith.constant 0 : index
    %0 = vector.load %arg2[%c0, %c0_0] : memref<8x128xf32, #tpu.memory_space<vmem>>, vector<8x128xf32>
    %c0_1 = arith.constant 0 : index
    %c0_2 = arith.constant 0 : index
    %1 = vector.load %arg4[%c0_1, %c0_2] : memref<128x128xf32, #tpu.memory_space<vmem>>, vector<128x128xf32>
    %cst = arith.constant dense<0.000000e+00> : vector<8x128xf32>
    %2 = tpu.matmul %0, %1, %cst {dimension_numbers = #tpu.dot_dimension_numbers<[1], [1], [0], [0], [0, 0, 1, 0], [], []>} : vector<8x128xf32>, vector<128x128xf32>, vector<8x128xf32> -> vector<8x128xf32>
    %c0_3 = arith.constant 0 : index
    %c0_4 = arith.constant 0 : index
    %3 = vector.load %arg3[%c0_3, %c0_4] : memref<8x128xf32, #tpu.memory_space<vmem>>, vector<8x128xf32>
    %c0_5 = arith.constant 0 : index
    %c0_6 = arith.constant 0 : index
    %4 = vector.load %arg5[%c0_5, %c0_6] : memref<128x128xf32, #tpu.memory_space<vmem>>, vector<128x128xf32>
    %cst_7 = arith.constant dense<0.000000e+00> : vector<8x128xf32>
    %5 = tpu.matmul %3, %4, %cst_7 {dimension_numbers = #tpu.dot_dimension_numbers<[1], [1], [0], [0], [0, 0, 1, 0], [], []>} : vector<8x128xf32>, vector<128x128xf32>, vector<8x128xf32> -> vector<8x128xf32>
    %c0_8 = arith.constant 0 : index
    %c0_9 = arith.constant 0 : index
    %6 = vector.load %arg6[%c0_8, %c0_9] : memref<1x128xf32, #tpu.memory_space<vmem>>, vector<1x128xf32>
    %7 = vector.broadcast %6 : vector<1x128xf32> to vector<8x128xf32>
    %8 = arith.mulf %7, %5 : vector<8x128xf32>
    %9 = arith.addf %2, %8 : vector<8x128xf32>
    %c0_10 = arith.constant 0 : index
    %c0_11 = arith.constant 0 : index
    %10 = vector.load %arg7[%c0_10, %c0_11] : memref<1x128xf32, #tpu.memory_space<vmem>>, vector<1x128xf32>
    %11 = vector.broadcast %10 : vector<1x128xf32> to vector<8x128xf32>
    %12 = arith.addf %9, %11 : vector<8x128xf32>
    %c0_12 = arith.constant 0 : index
    %c0_13 = arith.constant 0 : index
    %13 = vector.load %arg8[%c0_12, %c0_13] : memref<8x128xf32, #tpu.memory_space<vmem>>, vector<8x128xf32>
    tpu.vector_store %arg8[%c0_12, %c0_13], %12 {strides = array<i32>} : memref<8x128xf32, #tpu.memory_space<vmem>>, vector<8x128xf32>,
    return
  }
  func.func @transform_0(%arg0: i32, %arg1: i32) -> (i32, i32) {
    %c0_i32 = arith.constant 0 : i32
    %c0_i32_0 = arith.constant 0 : i32
    return %arg0, %c0_i32 : i32, i32
  }
  func.func @transform_1(%arg0: i32, %arg1: i32) -> (i32, i32) {
    %c0_i32 = arith.constant 0 : i32
    %c0_i32_0 = arith.constant 0 : i32
    return %arg0, %c0_i32 : i32, i32
  }
  func.func @transform_2(%arg0: i32, %arg1: i32) -> (i32, i32) {
    %c0_i32 = arith.constant 0 : i32
    %c0_i32_0 = arith.constant 0 : i32
    return %arg1, %c0_i32 : i32, i32
  }
  func.func @transform_3(%arg0: i32, %arg1: i32) -> (i32, i32) {
    %c0_i32 = arith.constant 0 : i32
    %c0_i32_0 = arith.constant 0 : i32
    return %arg1, %c0_i32 : i32, i32
  }
  func.func @transform_4(%arg0: i32, %arg1: i32) -> (i32, i32) {
    %c0_i32 = arith.constant 0 : i32
    %c0_i32_0 = arith.constant 0 : i32
    return %c0_i32, %arg1 : i32, i32
  }
  func.func @transform_5(%arg0: i32, %arg1: i32) -> (i32, i32) {
    %c0_i32 = arith.constant 0 : i32
    %c0_i32_0 = arith.constant 0 : i32
    return %c0_i32, %arg1 : i32, i32
  }
  func.func @transform_6(%arg0: i32, %arg1: i32) -> (i32, i32) {
    %c0_i32 = arith.constant 0 : i32
    return %arg0, %arg1 : i32, i32
  }
}

</mosaic_0001>

<bundles_post_ra>
// kernel: tpu_custom_call.1
= control target key start
LH: loop header
LB: loop body
LE: loop exit
PB: predicated region body
PF: predicated region fallthrough
CT: control target
= control target key end

     0   :  { %11 = vsyncpa [#allocation3], 0  ;;  %s692_s0 = inlined_call_operand.hbm [shape: f32[8,128], index: 0, kind: input, shape index: {}]   ;;  %s693_s1 = inlined_call_operand.hbm [shape: f32[8,128], index: 1, kind: input, shape index: {}]   ;;  %s694_s2 = inlined_call_operand.hbm [shape: f32[128,128], index: 2, kind: input, shape index: {}]   ;;  %s695_s3 = inlined_call_operand.hbm [shape: f32[128,128], index: 3, kind: input, shape index: {}]   ;;  %s696_s4 = inlined_call_operand.vmem [shape: f32[1,128], index: 4, kind: input, shape index: {}]   ;;  %s697_s5 = inlined_call_operand.vmem [shape: f32[1,128], index: 5, kind: input, shape index: {}]   ;;  %s698_s6 = inlined_call_operand.hbm [shape: f32[8,128], index: 6, kind: output, shape index: {}]  }
   0x1   :  { %12 = vsyncpa [#allocation6], 0 }
   0x2   :  { %13 = vsyncpa [#allocation9], 0 }
   0x3   :  { %14 = vsyncpa [#allocation4], 0  ;;  %s565_s21 = smov [#allocation5]   ;;  %s566_s23 = smov [#allocation2]  }
   0x4   :  { %s31_s22 = sshll.u32 %s565_s21, 4  ;;  %s21_s24 = sshll.u32 %s566_s23, 4  ;;  %s32_s22 = int_to_ptr.vmem [resolvable:$true] %s31_s22  ;;  %s22_s24 = int_to_ptr.vmem [resolvable:$true] %s21_s24 }
   0x5   :  { %s447_s27 = scalar_lea.hbm %s693_s1, 128 }
   0x6   :  { %p448_p0 = scmp.ne.s32.totalorder %s693_s1, %s447_s27  ;;  %p451_p1 = scmp.lt.u32.totalorder %s447_s27, %s693_s1 }
   0x8   :  { %p453_p2 = pnand %p451_p1, %p448_p0 }
   0xa   :  { %456 = shalt.err (!%p453_p2)
}
   0xb   :  { %s457_s8 = scalar_lea.vmem %s32_s22, 128  ;;  %p462_p4 = scmp.lt.s32.totalorder %s32_s22, %s32_s22 }
   0xc   :  { %p458_p3 = scmp.ne.s32.totalorder %s32_s22, %s457_s8  ;;  %p463_p5 = scmp.lt.s32.totalorder %s457_s8, %s457_s8 }
   0xe   :  { %p464_p6 = por %p463_p5, %p462_p4 }
  0x10   :  { %p465_p7 = pnand %p464_p6, %p458_p3 }
  0x12   :  { %468 = shalt.err (!%p465_p7)
}
  0x13   :  { %34 = dma.hbm_to_vmem [thread:$0]  %s693_s1, 128, %s32_s22, [#allocation6]  }
  0x14   :  { %s469_s13 = scalar_lea.hbm %s692_s0, 128 }
  0x15   :  { %p470_p8 = scmp.ne.s32.totalorder %s692_s0, %s469_s13  ;;  %p473_p9 = scmp.lt.u32.totalorder %s469_s13, %s692_s0 }
  0x17   :  { %p475_p10 = pnand %p473_p9, %p470_p8 }
  0x19   :  { %478 = shalt.err (!%p475_p10)
}
  0x1a   :  { %s479_s18 = scalar_lea.vmem %s22_s24, 128  ;;  %p484_p12 = scmp.lt.s32.totalorder %s22_s24, %s22_s24 }
  0x1b   :  { %p480_p11 = scmp.ne.s32.totalorder %s22_s24, %s479_s18  ;;  %p485_p13 = scmp.lt.s32.totalorder %s479_s18, %s479_s18 }
  0x1d   :  { %p486_p0 = por %p485_p13, %p484_p12 }
  0x1f   :  { %p487_p1 = pnand %p486_p0, %p480_p11 }
  0x21   :  { %490 = shalt.err (!%p487_p1)
}
  0x22   :  { %24 = dma.hbm_to_vmem [thread:$0]  %s692_s0, 128, %s22_s24, [#allocation3]  }
  0x23   :  { %s567_s20 = smov [#allocation7]   ;;  %s491_s25 = scalar_lea.hbm %s694_s2, 2048 }
  0x24   :  { %s40_s21 = sshll.u32 %s567_s20, 4  ;;  %p492_p2 = scmp.ne.s32.totalorder %s694_s2, %s491_s25  ;;  %s41_s21 = int_to_ptr.vmem [resolvable:$true] %s40_s21 }
  0x25   :  { %p495_p3 = scmp.lt.u32.totalorder %s491_s25, %s694_s2 }
  0x27   :  { %p497_p4 = pnand %p495_p3, %p492_p2 }
  0x29   :  { %500 = shalt.err (!%p497_p4)
}
  0x2a   :  { %s501_s30 = scalar_lea.vmem %s41_s21, 2048  ;;  %p506_p6 = scmp.lt.s32.totalorder %s41_s21, %s41_s21 }
  0x2b   :  { %p502_p5 = scmp.ne.s32.totalorder %s41_s21, %s501_s30  ;;  %p507_p7 = scmp.lt.s32.totalorder %s501_s30, %s501_s30 }
  0x2d   :  { %p508_p8 = por %p507_p7, %p506_p6 }
  0x2f   :  { %p509_p9 = pnand %p508_p8, %p502_p5 }
  0x31   :  { %512 = shalt.err (!%p509_p9)
}
  0x32   :  { %s568_s0 = smov 128   ;;  %s569_s24 = smov 8  }
  0x33   :  { %46 = dma.hbm_to_vmem [thread:$0]  %s694_s2, 2048, %s41_s21, [#allocation6], %s568_s0, %s568_s0, %s569_s24  }
  0x34   :  { %s570_s9 = smov [#allocation8]   ;;  %s513_s13 = scalar_lea.hbm %s695_s3, 2048 }
  0x35   :  { %s52_s10 = sshll.u32 %s570_s9, 4  ;;  %p514_p10 = scmp.ne.s32.totalorder %s695_s3, %s513_s13  ;;  %s53_s10 = int_to_ptr.vmem [resolvable:$true] %s52_s10 }
  0x36   :  { %p517_p11 = scmp.lt.u32.totalorder %s513_s13, %s695_s3 }
  0x38   :  { %p519_p12 = pnand %p517_p11, %p514_p10 }
  0x3a   :  { %522 = shalt.err (!%p519_p12)
}
  0x3b   :  { %s523_s18 = scalar_lea.vmem %s53_s10, 2048  ;;  %p528_p0 = scmp.lt.s32.totalorder %s53_s10, %s53_s10 }
  0x3c   :  { %p524_p13 = scmp.ne.s32.totalorder %s53_s10, %s523_s18  ;;  %p529_p1 = scmp.lt.s32.totalorder %s523_s18, %s523_s18 }
  0x3e   :  { %p530_p2 = por %p529_p1, %p528_p0 }
  0x40   :  { %p531_p3 = pnand %p530_p2, %p524_p13 }
  0x42   :  { %534 = shalt.err (!%p531_p3)
}
  0x43   :  { %58 = dma.hbm_to_vmem [thread:$0]  %s695_s3, 2048, %s53_s10, [#allocation9], %s568_s0, %s568_s0, %s569_s24  }
  0x44   :  { %557 = dma.done.wait [#allocation3], 128  }
  0x45   :  { %558 = vsyncadd [#allocation3], 4294967168 }
  0x46   :  { %559 = dma.done.wait [#allocation6], 2176  }
  0x47   :  { %560 = vsyncadd [#allocation6], 4294965120 }
  0x48   :  { %561 = dma.done.wait [#allocation9], 2048  }
  0x49   :  { %562 = vsyncadd [#allocation9], 4294965248  ;;  %v571_v0 = vmov 0.0|0.0   ;;  %vm572_vm0 = vmmov 0   ;;  %v573_v1 = vmov 0.0   ;;  %v93_v2 = vld [vmem:[#allocation8] sm:$0xff] }
  0x4a   :  { %389 = vmatprep.subr.bf16.mxu0 %v571_v0  ;;  %413 = vmatprep.subr.bf16.mxu1 %v571_v0  ;;  %v94_v3 = vld [vmem:[#allocation8 + $0x8] sm:$0xff]  ;;  %v76_v4 = vld [vmem:[#allocation7] sm:$0xff]  ;;  %v95_v8 = vld [vmem:[#allocation8 + $0x10] sm:$0xff]  ;;  %s574_s22 = smov [#allocation10]  }
  0x4b   :  { %351 = vmatprep.mubr.msk.f32.mxu0 %vm572_vm0, %v573_v1  ;;  %386 = vmatprep.mubr.msk.f32.mxu1 %vm572_vm0, %v573_v1  ;;  %v390_v5 = vpack.c.bf16 %v94_v3, %v93_v2  ;;  %v77_v6 = vld [vmem:[#allocation7 + $0x8] sm:$0xff]  ;;  %v96_v9 = vld [vmem:[#allocation8 + $0x18] sm:$0xff]  ;;  %v78_v10 = vld [vmem:[#allocation7 + $0x10] sm:$0xff]  ;;  %s272_s23 = sshll.u32 %s574_s22, 4  ;;  %s273_s23 = int_to_ptr.vmem [resolvable:$true] %s272_s23 }
  0x4c   :  { %v414_v7 = vpack.c.bf16 %v77_v6, %v76_v4  ;;  %v79_v11 = vld [vmem:[#allocation7 + $0x18] sm:$0xff]  ;;  %v393_v12 = vpack.c.bf16 %v96_v9, %v95_v8  ;;  %v97_v14 = vld [vmem:[#allocation8 + $0x20] sm:$0xff]  ;;  %v98_v15 = vld [vmem:[#allocation8 + $0x28] sm:$0xff]  ;;  %s535_s25 = scalar_lea.vmem %s273_s23, 128  ;;  %p540_p5 = scmp.lt.s32.totalorder %s273_s23, %s273_s23 }
  0x4d   :  { %391 = vmatpush3.bf16.xpose.msra.mxu0 %v390_v5  ;;  %v417_v13 = vpack.c.bf16 %v79_v11, %v78_v10  ;;  %v80_v16 = vld [vmem:[#allocation7 + $0x20] sm:$0xff]  ;;  %v81_v17 = vld [vmem:[#allocation7 + $0x28] sm:$0xff]  ;;  %v396_v18 = vpack.c.bf16 %v98_v15, %v97_v14  ;;  %v99_v20 = vld [vmem:[#allocation8 + $0x30] sm:$0xff]  ;;  %p536_p4 = scmp.ne.s32.totalorder %s273_s23, %s535_s25  ;;  %p541_p6 = scmp.lt.s32.totalorder %s535_s25, %s535_s25 }
  0x4e   :  { %415 = vmatpush3.bf16.xpose.msra.mxu1 %v414_v7  ;;  %392 = vmatprep.subr.bf16.mxu0 %v571_v0  ;;  %v420_v19 = vpack.c.bf16 %v81_v17, %v80_v16  ;;  %v100_v21 = vld [vmem:[#allocation8 + $0x38] sm:$0xff]  ;;  %v82_v22 = vld [vmem:[#allocation7 + $0x30] sm:$0xff]  ;;  %v101_v26 = vld [vmem:[#allocation8 + $0x40] sm:$0xff] }
  0x4f   :  { %416 = vmatprep.subr.bf16.mxu1 %v571_v0  ;;  %v83_v23 = vld [vmem:[#allocation7 + $0x38] sm:$0xff]  ;;  %v399_v24 = vpack.c.bf16 %v100_v21, %v99_v20  ;;  %v102_v27 = vld [vmem:[#allocation8 + $0x48] sm:$0xff]  ;;  %v84_v28 = vld [vmem:[#allocation7 + $0x40] sm:$0xff]  ;;  %p542_p7 = por %p541_p6, %p540_p5 }
  0x50   :  { %v423_v25 = vpack.c.bf16 %v83_v23, %v82_v22  ;;  %v85_v29 = vld [vmem:[#allocation7 + $0x48] sm:$0xff]  ;;  %v402_v30 = vpack.c.bf16 %v102_v27, %v101_v26  ;;  %v103_v32 = vld [vmem:[#allocation8 + $0x50] sm:$0xff]  ;;  %v104_v33 = vld [vmem:[#allocation8 + $0x58] sm:$0xff] }
  0x51   :  { %v426_v31 = vpack.c.bf16 %v85_v29, %v84_v28  ;;  %v86_v34 = vld [vmem:[#allocation7 + $0x50] sm:$0xff]  ;;  %v87_v35 = vld [vmem:[#allocation7 + $0x58] sm:$0xff]  ;;  %v405_v36 = vpack.c.bf16 %v104_v33, %v103_v32  ;;  %v105_v38 = vld [vmem:[#allocation8 + $0x60] sm:$0xff]  ;;  %p543_p8 = pnand %p542_p7, %p536_p4 }
  0x52   :  { %v429_v37 = vpack.c.bf16 %v87_v35, %v86_v34  ;;  %v106_v39 = vld [vmem:[#allocation8 + $0x68] sm:$0xff]  ;;  %v88_v40 = vld [vmem:[#allocation7 + $0x60] sm:$0xff]  ;;  %v107_v44 = vld [vmem:[#allocation8 + $0x70] sm:$0xff] }
  0x53   :  { %v89_v41 = vld [vmem:[#allocation7 + $0x68] sm:$0xff]  ;;  %v408_v42 = vpack.c.bf16 %v106_v39, %v105_v38  ;;  %v108_v45 = vld [vmem:[#allocation8 + $0x78] sm:$0xff]  ;;  %v90_v46 = vld [vmem:[#allocation7 + $0x70] sm:$0xff] }
  0x54   :  { %v432_v43 = vpack.c.bf16 %v89_v41, %v88_v40  ;;  %v91_v47 = vld [vmem:[#allocation7 + $0x78] sm:$0xff]  ;;  %v411_v48 = vpack.c.bf16 %v108_v45, %v107_v44  ;;  %v75_v51 = vld [vmem:[#allocation2] sm:$0xff] }
  0x55   :  { %394 = vmatpush3.bf16.xpose.msra.mxu0 %v393_v12  ;;  %v435_v49 = vpack.c.bf16 %v91_v47, %v90_v46  ;;  %v92_v50 = vld [vmem:[#allocation5] sm:$0xff]  ;;  %v283_v52 = vld [vmem:[%s696_s4] ss:$0 sm:$0xff] }
  0x56   :  { %418 = vmatpush3.bf16.xpose.msra.mxu1 %v417_v13  ;;  %395 = vmatprep.subr.bf16.mxu0 %v571_v0  ;;  %v284_v57 = vld [vmem:[%s697_s5] ss:$0 sm:$0xff] }
  0x57   :  { %419 = vmatprep.subr.bf16.mxu1 %v571_v0 }
  0x5d   :  { %397 = vmatpush3.bf16.xpose.msra.mxu0 %v396_v18 }
  0x5e   :  { %421 = vmatpush3.bf16.xpose.msra.mxu1 %v420_v19  ;;  %398 = vmatprep.subr.bf16.mxu0 %v571_v0 }
  0x5f   :  { %422 = vmatprep.subr.bf16.mxu1 %v571_v0 }
  0x65   :  { %400 = vmatpush3.bf16.xpose.msra.mxu0 %v399_v24 }
  0x66   :  { %424 = vmatpush3.bf16.xpose.msra.mxu1 %v423_v25  ;;  %401 = vmatprep.subr.bf16.mxu0 %v571_v0 }
  0x67   :  { %425 = vmatprep.subr.bf16.mxu1 %v571_v0 }
  0x6d   :  { %403 = vmatpush3.bf16.xpose.msra.mxu0 %v402_v30 }
  0x6e   :  { %427 = vmatpush3.bf16.xpose.msra.mxu1 %v426_v31  ;;  %404 = vmatprep.subr.bf16.mxu0 %v571_v0 }
  0x6f   :  { %428 = vmatprep.subr.bf16.mxu1 %v571_v0 }
  0x75   :  { %406 = vmatpush3.bf16.xpose.msra.mxu0 %v405_v36 }
  0x76   :  { %430 = vmatpush3.bf16.xpose.msra.mxu1 %v429_v37  ;;  %407 = vmatprep.subr.bf16.mxu0 %v571_v0 }
  0x77   :  { %431 = vmatprep.subr.bf16.mxu1 %v571_v0 }
  0x7d   :  { %409 = vmatpush3.bf16.xpose.msra.mxu0 %v408_v42 }
  0x7e   :  { %433 = vmatpush3.bf16.xpose.msra.mxu1 %v432_v43  ;;  %410 = vmatprep.subr.bf16.mxu0 %v571_v0 }
  0x7f   :  { %434 = vmatprep.subr.bf16.mxu1 %v571_v0 }
  0x85   :  { %412 = vmatpush3.bf16.xpose.msra.mxu0 %v411_v48 }
  0x86   :  { %436 = vmatpush3.bf16.xpose.msra.mxu1 %v435_v49 }
  0x8c   :  { %352 = vmatmul.mubr.f32.vlgmr.msra.gmra.mrb[0].mxu0 %v92_v50 }
  0x8d   :  { %387 = vmatmul.mubr.f32.vlgmr.msra.gmra.mrb[0].mxu1 %v75_v51 }
 0x15f   :  { %v175_v53 = vpop.f32.mrb[0].mxu0 }
 0x160   :  { %v186_v54 = vmul.f32 %v283_v52, %v175_v53  ;;  %v353_v55 = vpop.f32.mrb[1].mxu0  ;;  %v253_v56 = vpop.f32.mrb[0].mxu1 }
 0x161   :  { %v388_v58 = vpop.f32.mrb[1].mxu1 }
 0x162   :  { %v254_v59 = vadd.f32 %v253_v56, %v186_v54 }
 0x164   :  { %v264_v60 = vadd.f32 %v284_v57, %v254_v59 }
 0x166   :  { %265 = vst [vmem:[#allocation10] sm:$0xff] %v264_v60 }
 0x167   :  { %546 = shalt.err (!%p543_p8)
}
 0x168   :  { %s547_s27 = scalar_lea.hbm %s698_s6, 128 }
 0x169   :  { %p548_p9 = scmp.ne.s32.totalorder %s698_s6, %s547_s27  ;;  %p551_p10 = scmp.lt.u32.totalorder %s547_s27, %s698_s6 }
 0x16b   :  { %p553_p11 = pnand %p551_p10, %p548_p9 }
 0x16d   :  { %556 = shalt.err (!%p553_p11)
}
 0x16e   :  { %275 = dma.vmem_to_hbm [thread:$0]  %s273_s23, 128, %s698_s6, [#allocation4]  }
 0x16f   :  { %563 = dma.done.wait [#allocation4], 128  }
 0x170   :  { %564 = vsyncadd [#allocation4], 4294967168 }
 0x171   :  { %279 = vsyncpa [#allocation3], 1 }
 0x172   :  { %280 = vsyncpa [#allocation6], 1 }
 0x173   :  { %281 = vsyncpa [#allocation9], 1 }
 0x174   :  { %282 = vsyncpa [#allocation4], 1 }

</bundles_post_ra>
